<compile_context>
chip_gen: v5e
topology: v5e:2x2
jax: 0.10.0
libtpu: 0.0.40
codegen_flags: <defaults>
</compile_context>

<pallas_src>
import functools

import jax
import jax.numpy as jnp
from jax.experimental import pallas as pl
from jax.experimental.pallas import tpu as pltpu

EPS = 1e-5
NEG_SLOPE = 0.01
LANE = 128


def simple_nn_kernel(x_ref, w_ref, vec_ref, out_ref):
    """Fused forward.
    w_ref  : (4, 128, 128) f32 zero-padded weights (fc1..fc4).
    vec_ref: (8, 128) f32 rows = [g1, be1, g2, be2, g3, be3, b4, 0], zero-padded lanes.
    """
    in_dim = x_ref.shape[1]

    def bn_fold(h, idx):
        # Training-mode BatchNorm1d folded to one per-column scale/shift so the hot
        # (B, 128) tensor only sees one mul + one add.  Padded columns have gamma=0,
        # beta=0 and h=0, so they stay exactly 0 through the fold.
        gamma = vec_ref[2 * idx:2 * idx + 1, :]
        beta = vec_ref[2 * idx + 1:2 * idx + 2, :]
        mean = jnp.mean(h, axis=0, keepdims=True)
        var = jnp.mean(h * h, axis=0, keepdims=True) - mean * mean
        var = jnp.maximum(var, 0.0)                   # guard one-pass variance >= 0
        scale = gamma * jax.lax.rsqrt(var + EPS)      # EUP rsqrt (free slot)
        shift = beta - mean * scale
        return h * scale + shift

    def leaky_relu(h):
        # Single VPU max; equivalent to where(h>=0, h, 0.01*h) for slope in (0, 1).
        return jnp.maximum(h, NEG_SLOPE * h)

    # Layer 1: fc1 (bias dropped - cancelled by bn1 mean subtraction) -> bn1 -> leaky_relu.
    # Only the first in_dim rows of the padded w1 are real; the static slice is free.
    w1 = w_ref[0][:in_dim, :]
    h = jnp.dot(x_ref[...], w1, preferred_element_type=jnp.float32)
    h = leaky_relu(bn_fold(h, 0))

    # Layer 2: fc2 (bias dropped) -> bn2 -> leaky_relu
    h = jnp.dot(h, w_ref[1], preferred_element_type=jnp.float32)
    h = leaky_relu(bn_fold(h, 1))

    # Layer 3: fc3 (bias dropped) -> bn3 -> sigmoid
    h = jnp.dot(h, w_ref[2], preferred_element_type=jnp.float32)
    h = jax.nn.sigmoid(bn_fold(h, 2))

    # Layer 4: plain Linear.  Padded fan-in rows of w4 are zero, so the 0.5 values that
    # sigmoid produced in padded columns contribute nothing.  Lane-dense 128-wide store
    # (unmasked vst); the wrapper slices back to output_dim.
    out_ref[...] = (jnp.dot(h, w_ref[3], preferred_element_type=jnp.float32)
                    + vec_ref[6:7, :])


def prepare_params(params):
    """One-time packing of the parameter pytree (run once, OUTSIDE the hot path):
      w_blob : (4, 128, 128) f32  - fc1..fc4 weights, zero-padded lane/sublane-dense.
      bn_vec : (8, 128)      f32  - rows [g1, be1, g2, be2, g3, be3, b4, 0] (one vreg).
    fc1-3 biases are intentionally not packed: training-mode BN cancels them exactly.
    """
    def pad_w(w):
        r, c = w.shape
        assert r <= LANE and c <= LANE, "this packing assumes all layer widths <= 128"
        return jnp.pad(w, ((0, LANE - r), (0, LANE - c)))

    def pad_v(v):
        v = v.reshape(-1)
        return jnp.pad(v, (0, LANE - v.shape[0]))

    w_blob = jnp.stack([pad_w(params["w1"]), pad_w(params["w2"]),
                        pad_w(params["w3"]), pad_w(params["w4"])])
    bn_vec = jnp.stack([pad_v(params["g1"]), pad_v(params["be1"]),
                        pad_v(params["g2"]), pad_v(params["be2"]),
                        pad_v(params["g3"]), pad_v(params["be3"]),
                        pad_v(params["b4"]), jnp.zeros((LANE,), jnp.float32)])
    return w_blob, bn_vec


@functools.partial(jax.jit, static_argnames=("out_dim",))
def simple_nn_forward(x, w_blob, bn_vec, *, out_dim):
    """Hot path: a single fused, grid-less, fully VMEM-resident pallas_call.
    Working set < 300 KiB, so it fits the scoped-VMEM default on v5e/v6e/v7x with
    huge margin; no grid / no CompilerParams needed at these shapes."""
    batch = x.shape[0]
    vmem = pl.BlockSpec(memory_space=pltpu.MemorySpace.VMEM)
    out_padded = pl.pallas_call(
        simple_nn_kernel,
        out_shape=jax.ShapeDtypeStruct((batch, LANE), jnp.float32),
        in_specs=[vmem, vmem, vmem],
        out_specs=vmem,
    )(x, w_blob, bn_vec)
    return out_padded[:, :out_dim]


def init_params(key, input_dim, hidden_dim, output_dim):
    """Deterministic synthetic init mimicking PyTorch Linear's U(-1/sqrt(fan_in), +...)."""
    dims = [(input_dim, hidden_dim * 2),
            (hidden_dim * 2, hidden_dim),
            (hidden_dim, hidden_dim // 2),
            (hidden_dim // 2, output_dim)]
    params = {}
    for i, (fan_in, fan_out) in enumerate(dims, start=1):
        key, kw, kb = jax.random.split(key, 3)
        bound = 1.0 / jnp.sqrt(fan_in)
        params[f"w{i}"] = jax.random.uniform(kw, (fan_in, fan_out), jnp.float32,
                                             -bound, bound)
        params[f"b{i}"] = jax.random.uniform(kb, (1, fan_out), jnp.float32,
                                             -bound, bound)
    # BatchNorm affine params (PyTorch default: gamma=1, beta=0)
    for i, feat in enumerate([hidden_dim * 2, hidden_dim, hidden_dim // 2], start=1):
        params[f"g{i}"] = jnp.ones((1, feat), jnp.float32)
        params[f"be{i}"] = jnp.zeros((1, feat), jnp.float32)
    return params


def reference_forward(x, p):
    """PyTorch-faithful f32 reference (includes the b1-b3 biases that training-mode BN
    cancels, and the two-pass variance)."""
    def bn(h, g, b):
        m = jnp.mean(h, axis=0, keepdims=True)
        v = jnp.mean((h - m) ** 2, axis=0, keepdims=True)
        return (h - m) / jnp.sqrt(v + EPS) * g + b

    lrelu = lambda h: jnp.where(h >= 0, h, NEG_SLOPE * h)
    h = lrelu(bn(x @ p["w1"] + p["b1"], p["g1"], p["be1"]))
    h = lrelu(bn(h @ p["w2"] + p["b2"], p["g2"], p["be2"]))
    h = jax.nn.sigmoid(bn(h @ p["w3"] + p["b3"], p["g3"], p["be3"]))
    return h @ p["w4"] + p["b4"]


def matched_reference(x, p):
    """Pure-JAX replica of the kernel's exact math (f32 matmuls, folded one-pass BN,
    b1-b3 dropped) for a tighter check."""
    def bn(h, g, b):
        m = jnp.mean(h, axis=0, keepdims=True)
        v = jnp.maximum(jnp.mean(h * h, axis=0, keepdims=True) - m * m, 0.0)
        s = g * jax.lax.rsqrt(v + EPS)
        return h * s + (b - m * s)

    lrelu = lambda h: jnp.maximum(h, NEG_SLOPE * h)
    h = lrelu(bn(x @ p["w1"], p["g1"], p["be1"]))
    h = lrelu(bn(h @ p["w2"], p["g2"], p["be2"]))
    h = jax.nn.sigmoid(bn(h @ p["w3"], p["g3"], p["be3"]))
    return h @ p["w4"] + p["b4"]


if __name__ == "__main__":
    # Small shapes consistent with the module: batch=8, input_dim=16, hidden_dim=32, output_dim=4
    batch, input_dim, hidden_dim, output_dim = 8, 16, 32, 4

    key = jax.random.PRNGKey(0)
    key, kx = jax.random.split(key)
    x = jax.random.normal(kx, (batch, input_dim), jnp.float32)
    params = init_params(key, input_dim, hidden_dim, output_dim)

    # One-time parameter packing (hoisted out of the hot path per the perf review).
    w_blob, bn_vec = prepare_params(params)
    w_blob, bn_vec = jax.block_until_ready((w_blob, bn_vec))

    out = jax.block_until_ready(
        simple_nn_forward(x, w_blob, bn_vec, out_dim=output_dim))
    assert out.shape == (batch, output_dim)

    # Check against a pure-JAX replica of the kernel's exact math (tolerances cover
    # MXU pass-precision / EUP transcendental differences only).
    matched = matched_reference(x, params)
    assert jnp.allclose(out, matched, atol=2e-2, rtol=2e-2), \
        "Pallas output mismatch vs matched (folded-BN) reference"

    # Looser check against the PyTorch-faithful f32 reference (bias cancellation is
    # exact; remaining diffs are one-pass-vs-two-pass variance and matmul precision).
    ref = reference_forward(x, params)
    assert jnp.allclose(out, ref, atol=5e-2, rtol=5e-2), \
        "Pallas output mismatch vs f32 PyTorch-faithful reference"

    print("KERNEL_OK")
</pallas_src>

<mosaic_0001>
module attributes {stable_mosaic.version = 11 : i64} {
  func.func @simple_nn_kernel(%arg0: memref<8x16xf32, #tpu.memory_space<vmem>>, %arg1: memref<4x128x128xf32, #tpu.memory_space<vmem>>, %arg2: memref<8x128xf32, #tpu.memory_space<vmem>>, %arg3: memref<8x128xf32, #tpu.memory_space<vmem>>) attributes {dimension_semantics = [], scalar_prefetch = 0 : i64, scratch_operands = 0 : i64, tpu.core_type = #tpu.core_type<tc>} {
    %c0 = arith.constant 0 : index
    %c0_0 = arith.constant 0 : index
    %c0_1 = arith.constant 0 : index
    %0 = vector.load %arg1[%c0, %c0_0, %c0_1] : memref<4x128x128xf32, #tpu.memory_space<vmem>>, vector<1x128x128xf32>
    %1 = vector.shape_cast %0 : vector<1x128x128xf32> to vector<128x128xf32>
    %2 = vector.extract_strided_slice %1 {offsets = [0, 0], sizes = [16, 128], strides = [1, 1]} : vector<128x128xf32> to vector<16x128xf32>
    %c0_2 = arith.constant 0 : index
    %c0_3 = arith.constant 0 : index
    %3 = vector.load %arg0[%c0_2, %c0_3] : memref<8x16xf32, #tpu.memory_space<vmem>>, vector<8x16xf32>
    %cst = arith.constant dense<0.000000e+00> : vector<8x128xf32>
    %4 = tpu.matmul %3, %2, %cst {dimension_numbers = #tpu.dot_dimension_numbers<[1], [0], [0], [1], [0, 0, 1, 1], [], []>} : vector<8x16xf32>, vector<16x128xf32>, vector<8x128xf32> -> vector<8x128xf32>
    %c0_4 = arith.constant 0 : index
    %c0_5 = arith.constant 0 : index
    %5 = vector.load %arg2[%c0_4, %c0_5] : memref<8x128xf32, #tpu.memory_space<vmem>>, vector<1x128xf32>
    %c1 = arith.constant 1 : index
    %c0_6 = arith.constant 0 : index
    %6 = vector.load %arg2[%c1, %c0_6] : memref<8x128xf32, #tpu.memory_space<vmem>>, vector<1x128xf32>
    %cst_7 = arith.constant dense<0.000000e+00> : vector<128xf32>
    %7 = vector.multi_reduction <add>, %4, %cst_7 [0] : vector<8x128xf32> to vector<128xf32>
    %8 = vector.shape_cast %7 : vector<128xf32> to vector<1x128xf32>
    %cst_8 = arith.constant 8.000000e+00 : f32
    %9 = vector.broadcast %cst_8 : f32 to vector<1x128xf32>
    %10 = arith.divf %8, %9 : vector<1x128xf32>
    %11 = arith.mulf %4, %4 : vector<8x128xf32>
    %cst_9 = arith.constant dense<0.000000e+00> : vector<128xf32>
    %12 = vector.multi_reduction <add>, %11, %cst_9 [0] : vector<8x128xf32> to vector<128xf32>
    %13 = vector.shape_cast %12 : vector<128xf32> to vector<1x128xf32>
    %cst_10 = arith.constant 8.000000e+00 : f32
    %14 = vector.broadcast %cst_10 : f32 to vector<1x128xf32>
    %15 = arith.divf %13, %14 : vector<1x128xf32>
    %16 = arith.mulf %10, %10 : vector<1x128xf32>
    %17 = arith.subf %15, %16 : vector<1x128xf32>
    %cst_11 = arith.constant 0.000000e+00 : f32
    %18 = vector.broadcast %cst_11 : f32 to vector<1x128xf32>
    %19 = arith.maximumf %17, %18 : vector<1x128xf32>
    %cst_12 = arith.constant 9.99999974E-6 : f32
    %20 = vector.broadcast %cst_12 : f32 to vector<1x128xf32>
    %21 = arith.addf %19, %20 : vector<1x128xf32>
    %22 = math.rsqrt %21 : vector<1x128xf32>
    %23 = arith.mulf %5, %22 : vector<1x128xf32>
    %24 = arith.mulf %10, %23 : vector<1x128xf32>
    %25 = arith.subf %6, %24 : vector<1x128xf32>
    %26 = vector.broadcast %23 : vector<1x128xf32> to vector<8x128xf32>
    %27 = arith.mulf %4, %26 : vector<8x128xf32>
    %28 = vector.broadcast %25 : vector<1x128xf32> to vector<8x128xf32>
    %29 = arith.addf %27, %28 : vector<8x128xf32>
    %cst_13 = arith.constant 0.00999999977 : f32
    %30 = vector.broadcast %cst_13 : f32 to vector<8x128xf32>
    %31 = arith.mulf %30, %29 : vector<8x128xf32>
    %32 = arith.maximumf %29, %31 : vector<8x128xf32>
    %c1_14 = arith.constant 1 : index
    %c0_15 = arith.constant 0 : index
    %c0_16 = arith.constant 0 : index
    %33 = vector.load %arg1[%c1_14, %c0_15, %c0_16] : memref<4x128x128xf32, #tpu.memory_space<vmem>>, vector<1x128x128xf32>
    %34 = vector.shape_cast %33 : vector<1x128x128xf32> to vector<128x128xf32>
    %cst_17 = arith.constant dense<0.000000e+00> : vector<8x128xf32>
    %35 = tpu.matmul %32, %34, %cst_17 {dimension_numbers = #tpu.dot_dimension_numbers<[1], [0], [0], [1], [0, 0, 1, 1], [], []>} : vector<8x128xf32>, vector<128x128xf32>, vector<8x128xf32> -> vector<8x128xf32>
    %c2 = arith.constant 2 : index
    %c0_18 = arith.constant 0 : index
    %36 = vector.load %arg2[%c2, %c0_18] : memref<8x128xf32, #tpu.memory_space<vmem>>, vector<1x128xf32>
    %c3 = arith.constant 3 : index
    %c0_19 = arith.constant 0 : index
    %37 = vector.load %arg2[%c3, %c0_19] : memref<8x128xf32, #tpu.memory_space<vmem>>, vector<1x128xf32>
    %cst_20 = arith.constant dense<0.000000e+00> : vector<128xf32>
    %38 = vector.multi_reduction <add>, %35, %cst_20 [0] : vector<8x128xf32> to vector<128xf32>
    %39 = vector.shape_cast %38 : vector<128xf32> to vector<1x128xf32>
    %cst_21 = arith.constant 8.000000e+00 : f32
    %40 = vector.broadcast %cst_21 : f32 to vector<1x128xf32>
    %41 = arith.divf %39, %40 : vector<1x128xf32>
    %42 = arith.mulf %35, %35 : vector<8x128xf32>
    %cst_22 = arith.constant dense<0.000000e+00> : vector<128xf32>
    %43 = vector.multi_reduction <add>, %42, %cst_22 [0] : vector<8x128xf32> to vector<128xf32>
    %44 = vector.shape_cast %43 : vector<128xf32> to vector<1x128xf32>
    %cst_23 = arith.constant 8.000000e+00 : f32
    %45 = vector.broadcast %cst_23 : f32 to vector<1x128xf32>
    %46 = arith.divf %44, %45 : vector<1x128xf32>
    %47 = arith.mulf %41, %41 : vector<1x128xf32>
    %48 = arith.subf %46, %47 : vector<1x128xf32>
    %cst_24 = arith.constant 0.000000e+00 : f32
    %49 = vector.broadcast %cst_24 : f32 to vector<1x128xf32>
    %50 = arith.maximumf %48, %49 : vector<1x128xf32>
    %cst_25 = arith.constant 9.99999974E-6 : f32
    %51 = vector.broadcast %cst_25 : f32 to vector<1x128xf32>
    %52 = arith.addf %50, %51 : vector<1x128xf32>
    %53 = math.rsqrt %52 : vector<1x128xf32>
    %54 = arith.mulf %36, %53 : vector<1x128xf32>
    %55 = arith.mulf %41, %54 : vector<1x128xf32>
    %56 = arith.subf %37, %55 : vector<1x128xf32>
    %57 = vector.broadcast %54 : vector<1x128xf32> to vector<8x128xf32>
    %58 = arith.mulf %35, %57 : vector<8x128xf32>
    %59 = vector.broadcast %56 : vector<1x128xf32> to vector<8x128xf32>
    %60 = arith.addf %58, %59 : vector<8x128xf32>
    %cst_26 = arith.constant 0.00999999977 : f32
    %61 = vector.broadcast %cst_26 : f32 to vector<8x128xf32>
    %62 = arith.mulf %61, %60 : vector<8x128xf32>
    %63 = arith.maximumf %60, %62 : vector<8x128xf32>
    %c2_27 = arith.constant 2 : index
    %c0_28 = arith.constant 0 : index
    %c0_29 = arith.constant 0 : index
    %64 = vector.load %arg1[%c2_27, %c0_28, %c0_29] : memref<4x128x128xf32, #tpu.memory_space<vmem>>, vector<1x128x128xf32>
    %65 = vector.shape_cast %64 : vector<1x128x128xf32> to vector<128x128xf32>
    %cst_30 = arith.constant dense<0.000000e+00> : vector<8x128xf32>
    %66 = tpu.matmul %63, %65, %cst_30 {dimension_numbers = #tpu.dot_dimension_numbers<[1], [0], [0], [1], [0, 0, 1, 1], [], []>} : vector<8x128xf32>, vector<128x128xf32>, vector<8x128xf32> -> vector<8x128xf32>
    %c4 = arith.constant 4 : index
    %c0_31 = arith.constant 0 : index
    %67 = vector.load %arg2[%c4, %c0_31] : memref<8x128xf32, #tpu.memory_space<vmem>>, vector<1x128xf32>
    %c5 = arith.constant 5 : index
    %c0_32 = arith.constant 0 : index
    %68 = vector.load %arg2[%c5, %c0_32] : memref<8x128xf32, #tpu.memory_space<vmem>>, vector<1x128xf32>
    %cst_33 = arith.constant dense<0.000000e+00> : vector<128xf32>
    %69 = vector.multi_reduction <add>, %66, %cst_33 [0] : vector<8x128xf32> to vector<128xf32>
    %70 = vector.shape_cast %69 : vector<128xf32> to vector<1x128xf32>
    %cst_34 = arith.constant 8.000000e+00 : f32
    %71 = vector.broadcast %cst_34 : f32 to vector<1x128xf32>
    %72 = arith.divf %70, %71 : vector<1x128xf32>
    %73 = arith.mulf %66, %66 : vector<8x128xf32>
    %cst_35 = arith.constant dense<0.000000e+00> : vector<128xf32>
    %74 = vector.multi_reduction <add>, %73, %cst_35 [0] : vector<8x128xf32> to vector<128xf32>
    %75 = vector.shape_cast %74 : vector<128xf32> to vector<1x128xf32>
    %cst_36 = arith.constant 8.000000e+00 : f32
    %76 = vector.broadcast %cst_36 : f32 to vector<1x128xf32>
    %77 = arith.divf %75, %76 : vector<1x128xf32>
    %78 = arith.mulf %72, %72 : vector<1x128xf32>
    %79 = arith.subf %77, %78 : vector<1x128xf32>
    %cst_37 = arith.constant 0.000000e+00 : f32
    %80 = vector.broadcast %cst_37 : f32 to vector<1x128xf32>
    %81 = arith.maximumf %79, %80 : vector<1x128xf32>
    %cst_38 = arith.constant 9.99999974E-6 : f32
    %82 = vector.broadcast %cst_38 : f32 to vector<1x128xf32>
    %83 = arith.addf %81, %82 : vector<1x128xf32>
    %84 = math.rsqrt %83 : vector<1x128xf32>
    %85 = arith.mulf %67, %84 : vector<1x128xf32>
    %86 = arith.mulf %72, %85 : vector<1x128xf32>
    %87 = arith.subf %68, %86 : vector<1x128xf32>
    %88 = vector.broadcast %85 : vector<1x128xf32> to vector<8x128xf32>
    %89 = arith.mulf %66, %88 : vector<8x128xf32>
    %90 = vector.broadcast %87 : vector<1x128xf32> to vector<8x128xf32>
    %91 = arith.addf %89, %90 : vector<8x128xf32>
    %92 = arith.negf %91 : vector<8x128xf32>
    %93 = math.exp %92 : vector<8x128xf32>
    %cst_39 = arith.constant 1.000000e+00 : f32
    %94 = vector.broadcast %cst_39 : f32 to vector<8x128xf32>
    %95 = arith.addf %94, %93 : vector<8x128xf32>
    %96 = arith.divf %94, %95 : vector<8x128xf32>
    %c3_40 = arith.constant 3 : index
    %c0_41 = arith.constant 0 : index
    %c0_42 = arith.constant 0 : index
    %97 = vector.load %arg1[%c3_40, %c0_41, %c0_42] : memref<4x128x128xf32, #tpu.memory_space<vmem>>, vector<1x128x128xf32>
    %98 = vector.shape_cast %97 : vector<1x128x128xf32> to vector<128x128xf32>
    %cst_43 = arith.constant dense<0.000000e+00> : vector<8x128xf32>
    %99 = tpu.matmul %96, %98, %cst_43 {dimension_numbers = #tpu.dot_dimension_numbers<[1], [0], [0], [1], [0, 0, 1, 1], [], []>} : vector<8x128xf32>, vector<128x128xf32>, vector<8x128xf32> -> vector<8x128xf32>
    %c6 = arith.constant 6 : index
    %c0_44 = arith.constant 0 : index
    %100 = vector.load %arg2[%c6, %c0_44] : memref<8x128xf32, #tpu.memory_space<vmem>>, vector<1x128xf32>
    %101 = vector.broadcast %100 : vector<1x128xf32> to vector<8x128xf32>
    %102 = arith.addf %99, %101 : vector<8x128xf32>
    %c0_45 = arith.constant 0 : index
    %c0_46 = arith.constant 0 : index
    %103 = vector.load %arg3[%c0_45, %c0_46] : memref<8x128xf32, #tpu.memory_space<vmem>>, vector<8x128xf32>
    tpu.vector_store %arg3[%c0_45, %c0_46], %102 {strides = array<i32>} : memref<8x128xf32, #tpu.memory_space<vmem>>, vector<8x128xf32>,
    return
  }
}

</mosaic_0001>

<bundles_post_ra>
// kernel: simple_nn_forward.1
= control target key start
LH: loop header
LB: loop body
LE: loop exit
PB: predicated region body
PF: predicated region fallthrough
CT: control target
= control target key end

     0   :  { %8 = vsyncpa [#allocation3], 0  ;;  %s505_s0 = inlined_call_operand.hbm [shape: f32[8,16], index: 0, kind: input, shape index: {}]   ;;  %s506_s1 = inlined_call_operand.hbm [shape: f32[4,128,128], index: 1, kind: input, shape index: {}]   ;;  %s507_s2 = inlined_call_operand.hbm [shape: f32[8,128], index: 2, kind: input, shape index: {}]   ;;  %s508_s3 = inlined_call_operand.vmem [shape: f32[8,128], index: 3, kind: output, shape index: {}]  }
   0x1   :  { %9 = vsyncpa [#allocation5], 0  ;;  %s25_s14 = sshll.u32 %s506_s1, 4  ;;  %s445_s15 = smov [#allocation4]   ;;  %s26_s14 = int_to_ptr.hbm [resolvable:$true] %s25_s14 }
   0x2   :  { %s27_s16 = sshll.u32 %s445_s15, 4  ;;  %s15_s19 = sshll.u32 %s505_s0, 4  ;;  %s28_s16 = int_to_ptr.vmem [resolvable:$true] %s27_s16  ;;  %s16_s19 = int_to_ptr.hbm [resolvable:$true] %s15_s19 }
   0x3   :  { %s446_s20 = smov 128   ;;  %s447_s21 = smov 8  }
   0x4   :  { %33 = dma.hbm_to_vmem [thread:$0]  %s26_s14, 8192, %s28_s16, [#allocation5], %s446_s20, %s446_s20, %s447_s21  }
   0x5   :  { %s448_s22 = smov [#allocation2]   ;;  %s39_s26 = sshll.u32 %s507_s2, 4  ;;  %s40_s26 = int_to_ptr.hbm [resolvable:$true] %s39_s26 }
   0x6   :  { %s17_s23 = sshll.u32 %s448_s22, 4  ;;  %s449_s1 = smov [#allocation6]   ;;  %s18_s23 = int_to_ptr.vmem [resolvable:$true] %s17_s23 }
   0x7   :  { %20 = dma.hbm_to_vmem [thread:$0]  %s16_s19, 128, %s18_s23, [#allocation3]  }
   0x8   :  { %s41_s27 = sshll.u32 %s449_s1, 4  ;;  %s42_s27 = int_to_ptr.vmem [resolvable:$true] %s41_s27 }
   0x9   :  { %44 = dma.hbm_to_vmem [thread:$0]  %s40_s26, 128, %s42_s27, [#allocation5]  }
   0xa   :  { %441 = dma.done.wait [#allocation3], 128  }
   0xb   :  { %442 = vsyncadd [#allocation3], 4294967168 }
   0xc   :  { %443 = dma.done.wait [#allocation5], 8320  }
   0xd   :  { %444 = vsyncadd [#allocation5], 4294958976  ;;  %v58_v0 = vld [vmem:[#allocation4 + $0x8] sm:$0xff]  ;;  %v57_v1 = vld [vmem:[#allocation4] sm:$0xff]  ;;  %vm60_vm0 = vcmask 130048   ;;  %v450_v3 = vmov 8.0  }
   0xe   :  { %78 = vmatpush.msra.mxu0 %v58_v0  ;;  %v59_v2 = vld [vmem:[#allocation2] sm:$0xff]  ;;  %357 = vrcp.f32 %v450_v3  ;;  %v146_v6 = vld [vmem:[#allocation4 + $0xf0] sm:$0xff]  ;;  %v145_v8 = vld [vmem:[#allocation4 + $0xe8] sm:$0xff] }
   0xf   :  { %v147_v5 = vld [vmem:[#allocation4 + $0xf8] sm:$0xff]  ;;  %v144_v9 = vld [vmem:[#allocation4 + $0xe0] sm:$0xff]  ;;  %v142_v15 = vld [vmem:[#allocation4 + $0xd0] sm:$0xff] }
  0x10   :  { %79 = vmatpush.msra.mxu0 %v57_v1  ;;  %148 = vmatpush.msra.mxu1 %v147_v5  ;;  %v143_v11 = vld [vmem:[#allocation4 + $0xd8] sm:$0xff]  ;;  %v141_v19 = vld [vmem:[#allocation4 + $0xc8] sm:$0xff]  ;;  %v140_v22 = vld [vmem:[#allocation4 + $0xc0] sm:$0xff] }
  0x11   :  { %348 = vmatmul.msk.f32.vlgmr.msra.gmra.mxu0 %vm60_vm0, %v59_v2  ;;  %v139_v26 = vld [vmem:[#allocation4 + $0xb8] sm:$0xff]  ;;  %v138_v29 = vld [vmem:[#allocation4 + $0xb0] sm:$0xff]  ;;  %v137_v33 = vld [vmem:[#allocation4 + $0xa8] sm:$0xff] }
  0x12   :  { %149 = vmatpush.msra.mxu1 %v146_v6  ;;  %v136_v36 = vld [vmem:[#allocation4 + $0xa0] sm:$0xff]  ;;  %v135_v37 = vld [vmem:[#allocation4 + $0x98] sm:$0xff]  ;;  %v134_v40 = vld [vmem:[#allocation4 + $0x90] sm:$0xff] }
  0x13   :  { %v133_v42 = vld [vmem:[#allocation4 + $0x88] sm:$0xff]  ;;  %v132_v44 = vld [vmem:[#allocation4 + $0x80] sm:$0xff]  ;;  %v224_v0 = vld [vmem:[#allocation4 + $0x178] sm:$0xff] }
  0x14   :  { %v358_v4 = vpop.eup %357  ;;  %150 = vmatpush.msra.mxu1 %v145_v8  ;;  %v84_v51 = vld [vmem:[#allocation6] sm:$0x1]  ;;  %v85_v55 = vld [vmem:[#allocation6 + $0x1] sm:$0x1]  ;;  %225 = vmatpush.msra.mxu2 %v224_v0  ;;  %v223_v1 = vld [vmem:[#allocation4 + $0x170] sm:$0xff] }
  0x15   :  { %v93_v7 = vmul.f32 8.0, %v358_v4  ;;  %vm97_vm1 = vweird.f32 %v358_v4  ;;  %v222_v2 = vld [vmem:[#allocation4 + $0x168] sm:$0xff]  ;;  %v221_v3 = vld [vmem:[#allocation4 + $0x160] sm:$0xff]  ;;  %v219_v8 = vld [vmem:[#allocation4 + $0x150] sm:$0xff] }
  0x16   :  { %151 = vmatpush.msra.mxu1 %v144_v9  ;;  %226 = vmatpush.msra.mxu2 %v223_v1 }
  0x17   :  { %v94_v10 = vsub.f32 1.0, %v93_v7 }
  0x18   :  { %152 = vmatpush.msra.mxu1 %v143_v11  ;;  %227 = vmatpush.msra.mxu2 %v222_v2  ;;  %v218_v11 = vld [vmem:[#allocation4 + $0x148] sm:$0xff] }
  0x19   :  { %v95_v16 = vmul.f32 %v358_v4, %v94_v10 }
  0x1a   :  { %153 = vmatpush.msra.mxu1 %v142_v15  ;;  %228 = vmatpush.msra.mxu2 %v221_v3 }
  0x1b   :  { %v96_v23 = vadd.f32 %v358_v4, %v95_v16 }
  0x1c   :  { %154 = vmatpush.msra.mxu1 %v141_v19 }
  0x1d   :  { %v486_v30 = vsel %vm97_vm1, %v358_v4, %v96_v23  ;;  %v220_v4 = vld [vmem:[#allocation4 + $0x158] sm:$0xff]  ;;  %v214_v23 = vld [vmem:[#allocation4 + $0x128] sm:$0xff] }
  0x1e   :  { %155 = vmatpush.msra.mxu1 %v140_v22  ;;  %229 = vmatpush.msra.mxu2 %v220_v4 }
  0x20   :  { %156 = vmatpush.msra.mxu1 %v139_v26  ;;  %230 = vmatpush.msra.mxu2 %v219_v8  ;;  %v213_v26 = vld [vmem:[#allocation4 + $0x120] sm:$0xff]  ;;  %v318_v8 = vld [vmem:[#allocation4 + $0x1f8] sm:$0xff] }
  0x21   :  { %321 = vmatpush.msra.mxu3 %v318_v8 }
  0x22   :  { %157 = vmatpush.msra.mxu1 %v138_v29  ;;  %231 = vmatpush.msra.mxu2 %v218_v11 }
  0x24   :  { %158 = vmatpush.msra.mxu1 %v137_v33  ;;  %v210_v33 = vld [vmem:[#allocation4 + $0x108] sm:$0xff] }
  0x26   :  { %159 = vmatpush.msra.mxu1 %v136_v36 }
  0x28   :  { %160 = vmatpush.msra.mxu1 %v135_v37 }
  0x2a   :  { %161 = vmatpush.msra.mxu1 %v134_v40 }
  0x2c   :  { %162 = vmatpush.msra.mxu1 %v133_v42  ;;  %v168_v42 = vld [vmem:[#allocation6 + $0x2] sm:$0x1] }
  0x2e   :  { %163 = vmatpush.msra.mxu1 %v132_v44 }
  0x8e   :  { %v480_v12 = vpop.f32.mrf.mxu0 }
  0x8f   :  { %v86_v13 = vrot.slane %v480_v12, 4  ;;  %v100_v14 = vmul.f32 %v480_v12, %v480_v12 }
  0x91   :  { %v87_v17 = vadd.f32 %v86_v13, %v480_v12  ;;  %v101_v18 = vrot.slane %v100_v14, 4 }
  0x93   :  { %v88_v20 = vrot.slane %v87_v17, 2  ;;  %v102_v21 = vadd.f32 %v101_v18, %v100_v14  ;;  %v217_v14 = vld [vmem:[#allocation4 + $0x140] sm:$0xff] }
  0x94   :  { %232 = vmatpush.msra.mxu2 %v217_v14  ;;  %v315_v14 = vld [vmem:[#allocation4 + $0x1e0] sm:$0xff] }
  0x95   :  { %v89_v24 = vadd.f32 %v88_v20, %v87_v17  ;;  %v103_v25 = vrot.slane %v102_v21, 2  ;;  %v216_v17 = vld [vmem:[#allocation4 + $0x138] sm:$0xff]  ;;  %v215_v20 = vld [vmem:[#allocation4 + $0x130] sm:$0xff] }
  0x96   :  { %233 = vmatpush.msra.mxu2 %v216_v17  ;;  %v312_v17 = vld [vmem:[#allocation4 + $0x1c8] sm:$0xff] }
  0x97   :  { %v90_v27 = vrot.slane %v89_v24, 1  ;;  %v104_v28 = vadd.f32 %v103_v25, %v102_v21 }
  0x98   :  { %234 = vmatpush.msra.mxu2 %v215_v20  ;;  %v310_v20 = vld [vmem:[#allocation4 + $0x1b8] sm:$0xff] }
  0x99   :  { %v91_v31 = vadd.f32 %v90_v27, %v89_v24  ;;  %v105_v32 = vrot.slane %v104_v28, 1  ;;  %v212_v27 = vld [vmem:[#allocation4 + $0x118] sm:$0xff] }
  0x9a   :  { %235 = vmatpush.msra.mxu2 %v214_v23  ;;  %v308_v23 = vld [vmem:[#allocation4 + $0x1a8] sm:$0xff] }
  0x9b   :  { %v99_v34 = vmul.f32 %v486_v30, %v91_v31  ;;  %v106_v35 = vadd.f32 %v105_v32, %v104_v28  ;;  %v211_v31 = vld [vmem:[#allocation4 + $0x110] sm:$0xff] }
  0x9c   :  { %236 = vmatpush.msra.mxu2 %v213_v26 }
  0x9d   :  { %v107_v38 = vmul.f32 %v106_v35, %v486_v30  ;;  %v108_v39 = vmul.f32 %v99_v34, %v99_v34  ;;  %v209_v35 = vld [vmem:[#allocation4 + $0x100] sm:$0xff] }
  0x9e   :  { %237 = vmatpush.msra.mxu2 %v212_v27  ;;  %v306_v27 = vld [vmem:[#allocation4 + $0x198] sm:$0xff] }
  0x9f   :  { %v109_v41 = vsub.f32 %v107_v38, %v108_v39 }
  0xa0   :  { %238 = vmatpush.msra.mxu2 %v211_v31  ;;  %v305_v31 = vld [vmem:[#allocation4 + $0x190] sm:$0xff] }
  0xa1   :  { %v110_v43 = vmax.f32 %v109_v41, 0.0 }
  0xa2   :  { %239 = vmatpush.msra.mxu2 %v210_v33 }
  0xa3   :  { %v111_v45 = vadd.f32 1e-05, %v110_v43 }
  0xa4   :  { %240 = vmatpush.msra.mxu2 %v209_v35  ;;  %v246_v35 = vld [vmem:[#allocation6 + $0x5] sm:$0x1] }
  0xa5   :  { %359 = vrsqrt.f32 %v111_v45  ;;  %vm118_vm3 = vweird.f32 %v111_v45 }
  0xab   :  { %v360_v46 = vpop.eup %359 }
  0xac   :  { %v113_v47 = vmul.f32 %v360_v46, %v111_v45  ;;  %vm119_vm2 = vweird.f32 %v360_v46 }
  0xad   :  { %vm120_vm4 = vmor %vm118_vm3, %vm119_vm2 }
  0xae   :  { %v114_v48 = vmul.f32 %v360_v46, %v113_v47 }
  0xb0   :  { %v115_v49 = vmul.f32 0.5, %v114_v48 }
  0xb2   :  { %v116_v50 = vsub.f32 1.5, %v115_v49 }
  0xb4   :  { %v117_v52 = vmul.f32 %v360_v46, %v116_v50 }
  0xb6   :  { %v121_v53 = vsel %vm120_vm4, %v360_v46, %v117_v52  ;;  %v169_v46 = vld [vmem:[#allocation6 + $0x3] sm:$0x1] }
  0xb7   :  { %v122_v54 = vmul.f32 %v121_v53, %v84_v51 }
  0xb9   :  { %v125_v56 = vperm.slane %v122_v54, 0  ;;  %v123_v57 = vmul.f32 %v122_v54, %v99_v34 }
  0xbb   :  { %v124_v58 = vsub.f32 %v85_v55, %v123_v57  ;;  %v126_v59 = vmul.f32 %v125_v56, %v480_v12 }
  0xbd   :  { %v127_v60 = vperm.slane %v124_v58, 0 }
  0xbf   :  { %v128_v61 = vadd.f32 %v127_v60, %v126_v59 }
  0xc1   :  { %v129_v62 = vmul.f32 0.01, %v128_v61 }
  0xc3   :  { %v130_v63 = vmax.f32 %v128_v61, %v129_v62 }
  0xc5   :  { %164 = vmatmul.f32.vlgmr.msra.gmra.mxu1 %v130_v63 }
 0x142   :  { %v165_v5 = vpop.f32.mrf.mxu1 }
 0x143   :  { %v170_v6 = vrot.slane %v165_v5, 4  ;;  %v177_v7 = vmul.f32 %v165_v5, %v165_v5 }
 0x145   :  { %v171_v9 = vadd.f32 %v170_v6, %v165_v5  ;;  %v178_v10 = vrot.slane %v177_v7, 4 }
 0x147   :  { %v172_v12 = vrot.slane %v171_v9, 2  ;;  %v179_v13 = vadd.f32 %v178_v10, %v177_v7  ;;  %v317_v10 = vld [vmem:[#allocation4 + $0x1f0] sm:$0xff] }
 0x148   :  { %322 = vmatpush.msra.mxu3 %v317_v10 }
 0x149   :  { %v173_v15 = vadd.f32 %v172_v12, %v171_v9  ;;  %v180_v16 = vrot.slane %v179_v13, 2  ;;  %v316_v12 = vld [vmem:[#allocation4 + $0x1e8] sm:$0xff] }
 0x14a   :  { %323 = vmatpush.msra.mxu3 %v316_v12 }
 0x14b   :  { %v174_v18 = vrot.slane %v173_v15, 1  ;;  %v181_v19 = vadd.f32 %v180_v16, %v179_v13  ;;  %v313_v16 = vld [vmem:[#allocation4 + $0x1d0] sm:$0xff] }
 0x14c   :  { %324 = vmatpush.msra.mxu3 %v315_v14 }
 0x14d   :  { %v175_v21 = vadd.f32 %v174_v18, %v173_v15  ;;  %v182_v22 = vrot.slane %v181_v19, 1  ;;  %v314_v15 = vld [vmem:[#allocation4 + $0x1d8] sm:$0xff]  ;;  %v311_v18 = vld [vmem:[#allocation4 + $0x1c0] sm:$0xff] }
 0x14e   :  { %325 = vmatpush.msra.mxu3 %v314_v15 }
 0x14f   :  { %v176_v24 = vmul.f32 %v175_v21, %v486_v30  ;;  %v183_v25 = vadd.f32 %v182_v22, %v181_v19  ;;  %v309_v21 = vld [vmem:[#allocation4 + $0x1b0] sm:$0xff] }
 0x150   :  { %326 = vmatpush.msra.mxu3 %v313_v16 }
 0x151   :  { %v184_v28 = vmul.f32 %v183_v25, %v486_v30  ;;  %v185_v29 = vmul.f32 %v176_v24, %v176_v24  ;;  %v307_v25 = vld [vmem:[#allocation4 + $0x1a0] sm:$0xff] }
 0x152   :  { %327 = vmatpush.msra.mxu3 %v312_v17 }
 0x153   :  { %v186_v32 = vsub.f32 %v184_v28, %v185_v29  ;;  %v245_v28 = vld [vmem:[#allocation6 + $0x4] sm:$0x1] }
 0x154   :  { %328 = vmatpush.msra.mxu3 %v311_v18 }
 0x155   :  { %v187_v34 = vmax.f32 %v186_v32, 0.0 }
 0x156   :  { %329 = vmatpush.msra.mxu3 %v310_v20 }
 0x157   :  { %v188_v36 = vadd.f32 1e-05, %v187_v34  ;;  %v304_v34 = vld [vmem:[#allocation4 + $0x188] sm:$0xff] }
 0x158   :  { %330 = vmatpush.msra.mxu3 %v309_v21 }
 0x159   :  { %361 = vrsqrt.f32 %v188_v36  ;;  %vm195_vm6 = vweird.f32 %v188_v36 }
 0x15a   :  { %331 = vmatpush.msra.mxu3 %v308_v23 }
 0x15c   :  { %332 = vmatpush.msra.mxu3 %v307_v25 }
 0x15e   :  { %333 = vmatpush.msra.mxu3 %v306_v27 }
 0x15f   :  { %v362_v37 = vpop.eup %361 }
 0x160   :  { %v190_v38 = vmul.f32 %v362_v37, %v188_v36  ;;  %vm196_vm5 = vweird.f32 %v362_v37  ;;  %334 = vmatpush.msra.mxu3 %v305_v31 }
 0x161   :  { %vm197_vm7 = vmor %vm195_vm6, %vm196_vm5 }
 0x162   :  { %v191_v39 = vmul.f32 %v362_v37, %v190_v38  ;;  %v303_v38 = vld [vmem:[#allocation4 + $0x180] sm:$0xff]  ;;  %335 = vmatpush.msra.mxu3 %v304_v34 }
 0x164   :  { %v192_v40 = vmul.f32 0.5, %v191_v39  ;;  %336 = vmatpush.msra.mxu3 %v303_v38 }
 0x166   :  { %v193_v41 = vsub.f32 1.5, %v192_v40 }
 0x168   :  { %v194_v43 = vmul.f32 %v362_v37, %v193_v41 }
 0x16a   :  { %v198_v44 = vsel %vm197_vm7, %v362_v37, %v194_v43 }
 0x16b   :  { %v199_v45 = vmul.f32 %v198_v44, %v168_v42 }
 0x16d   :  { %v202_v47 = vperm.slane %v199_v45, 0  ;;  %v200_v48 = vmul.f32 %v199_v45, %v176_v24 }
 0x16f   :  { %v201_v49 = vsub.f32 %v169_v46, %v200_v48  ;;  %v203_v50 = vmul.f32 %v202_v47, %v165_v5 }
 0x171   :  { %v204_v51 = vperm.slane %v201_v49, 0 }
 0x173   :  { %v205_v52 = vadd.f32 %v204_v51, %v203_v50 }
 0x175   :  { %v206_v53 = vmul.f32 0.01, %v205_v52 }
 0x177   :  { %v207_v54 = vmax.f32 %v205_v52, %v206_v53 }
 0x179   :  { %241 = vmatmul.f32.vlgmr.msra.gmra.mxu2 %v207_v54 }
 0x1fc   :  { %v493_v55 = vpop.f32.mrf.mxu2 }
 0x1fd   :  { %v247_v56 = vrot.slane %v493_v55, 4  ;;  %v254_v57 = vmul.f32 %v493_v55, %v493_v55 }
 0x1ff   :  { %v248_v58 = vadd.f32 %v247_v56, %v493_v55  ;;  %v255_v59 = vrot.slane %v254_v57, 4  ;;  %v356_v56 = vld [vmem:[#allocation6 + $0x6] ss:$0 sm:$0xff] }
 0x201   :  { %v249_v60 = vrot.slane %v248_v58, 2  ;;  %v256_v61 = vadd.f32 %v255_v59, %v254_v57 }
 0x203   :  { %v250_v62 = vadd.f32 %v249_v60, %v248_v58  ;;  %v257_v63 = vrot.slane %v256_v61, 2 }
 0x205   :  { %v251_v0 = vrot.slane %v250_v62, 1  ;;  %v258_v1 = vadd.f32 %v257_v63, %v256_v61 }
 0x207   :  { %v252_v2 = vadd.f32 %v251_v0, %v250_v62  ;;  %v259_v3 = vrot.slane %v258_v1, 1 }
 0x209   :  { %v253_v4 = vmul.f32 %v252_v2, %v486_v30  ;;  %v260_v5 = vadd.f32 %v259_v3, %v258_v1 }
 0x20b   :  { %v261_v6 = vmul.f32 %v260_v5, %v486_v30  ;;  %v262_v7 = vmul.f32 %v253_v4, %v253_v4 }
 0x20d   :  { %v263_v9 = vsub.f32 %v261_v6, %v262_v7 }
 0x20f   :  { %v264_v11 = vmax.f32 %v263_v9, 0.0 }
 0x211   :  { %v265_v13 = vadd.f32 1e-05, %v264_v11 }
 0x213   :  { %363 = vrsqrt.f32 %v265_v13  ;;  %vm272_vm9 = vweird.f32 %v265_v13 }
 0x219   :  { %v364_v30 = vpop.eup %363 }
 0x21a   :  { %v267_v19 = vmul.f32 %v364_v30, %v265_v13  ;;  %vm273_vm8 = vweird.f32 %v364_v30 }
 0x21b   :  { %vm274_vm10 = vmor %vm272_vm9, %vm273_vm8 }
 0x21c   :  { %v268_v22 = vmul.f32 %v364_v30, %v267_v19 }
 0x21e   :  { %v269_v24 = vmul.f32 0.5, %v268_v22 }
 0x220   :  { %v270_v26 = vsub.f32 1.5, %v269_v24 }
 0x222   :  { %v271_v29 = vmul.f32 %v364_v30, %v270_v26 }
 0x224   :  { %v275_v32 = vsel %vm274_vm10, %v364_v30, %v271_v29 }
 0x225   :  { %v276_v33 = vmul.f32 %v275_v32, %v245_v28 }
 0x227   :  { %v277_v36 = vmul.f32 %v276_v33, %v253_v4  ;;  %v279_v37 = vperm.slane %v276_v33, 0 }
 0x229   :  { %v278_v39 = vsub.f32 %v246_v35, %v277_v36  ;;  %v280_v40 = vmul.f32 %v279_v37, %v493_v55 }
 0x22b   :  { %v281_v41 = vperm.slane %v278_v39, 0 }
 0x22d   :  { %v282_v42 = vadd.f32 %v281_v41, %v280_v40 }
 0x22f   :  { %v349_v43 = vmul.f32 -1.442695, %v282_v42 }
 0x231   :  { %365 = vpow2.f32 %v349_v43 }
 0x237   :  { %v366_v44 = vpop.eup %365 }
 0x238   :  { %v286_v45 = vadd.f32 1.0, %v366_v44 }
 0x23a   :  { %367 = vrcp.f32 %v286_v45  ;;  %v298_v49 = vand.u32 2147483648, %v286_v45  ;;  %v296_v51 = vand.u32 2147483647, %v286_v45  ;;  %vm292_vm12 = vweird.f32 %v286_v45 }
 0x23c   :  { %v299_v53 = vor.u32 1.1754944e-38, %v298_v49  ;;  %vm297_vm14 = vcmp.eq.f32.partialorder %v296_v51, 8.507059e+37 }
 0x240   :  { %v368_v46 = vpop.eup %367 }
 0x241   :  { %v288_v47 = vmul.f32 %v368_v46, %v286_v45  ;;  %vm293_vm11 = vweird.f32 %v368_v46 }
 0x242   :  { %vm294_vm13 = vmor %vm292_vm12, %vm293_vm11 }
 0x243   :  { %v289_v48 = vsub.f32 1.0, %v288_v47 }
 0x245   :  { %v290_v50 = vmul.f32 %v368_v46, %v289_v48 }
 0x247   :  { %v291_v52 = vadd.f32 %v368_v46, %v290_v50 }
 0x249   :  { %v295_v54 = vsel %vm294_vm13, %v368_v46, %v291_v52 }
 0x24a   :  { %v300_v55 = vsel %vm297_vm14, %v299_v53, %v295_v54 }
 0x24b   :  { %337 = vmatmul.f32.vlgmr.msra.gmra.mxu3 %v300_v55 }
 0x2ce   :  { %v338_v57 = vpop.f32.mrf.mxu3 }
 0x2cf   :  { %v339_v58 = vadd.f32 %v356_v56, %v338_v57 }
 0x2d1   :  { %341 = vst [vmem:[%s508_s3] sm:$0xff] %v339_v58 }
 0x2d2   :  { %346 = vsyncpa [#allocation3], 1 }
 0x2d3   :  { %347 = vsyncpa [#allocation5], 1 }

</bundles_post_ra>
